<compile_context>
chip_gen: v7x
topology: tpu7x:2x2x1
jax: 0.10.0
libtpu: 0.0.40
codegen_flags: <defaults>
</compile_context>

<pallas_src>
import functools

import jax
import jax.numpy as jnp
from jax.experimental import pallas as pl
from jax.experimental.pallas import tpu as pltpu

EPS = 1e-5
LANE = 128
VMEM_LIMIT = 48 * 1024 * 1024        # <= ~48 MiB scoped VMEM is safe on v5e/v6e/v7x
XW_RESIDENT_MAX_BYTES = 4 * 1024 * 1024   # ~8 MiB with double-buffering headroom


def _round_up(x, m):
    return ((x + m - 1) // m) * m


def _node_tiling(n):
    """(padded node count, row tile, K tile) for the A_hat aggregation grid."""
    if n <= 128:
        n_pad = _round_up(n, 8)
        return n_pad, n_pad, n_pad
    tile_m = 128
    for tile in (512, 256, 128):
        n_pad = _round_up(n, tile)
        if tile == 128 or (n_pad - n) * 8 <= n:   # zero-padding waste <= ~12.5%
            tile_m = tile
            break
    n_pad = _round_up(n, tile_m)
    tile_k = tile_m
    for cand in (4 * tile_m, 2 * tile_m):         # fewer grid steps on the K axis
        if n_pad % cand == 0:
            tile_k = cand
            break
    return n_pad, tile_m, tile_k


def _elem_tile(n_pad, tile_m, cap=2048):
    """Row tile for the pure elementwise pass (larger than the matmul tile)."""
    t = tile_m
    while t * 2 <= min(n_pad, cap) and n_pad % (t * 2) == 0:
        t *= 2
    return t


def _pad2d(arr, rows, cols, dtype=None):
    r, c = arr.shape
    out = jnp.pad(arr, ((0, rows - r), (0, cols - c)))
    return out.astype(dtype) if dtype is not None else out


# ---------------------------------------------------------------------------
# Kernel 1: feature projection  XW = X @ W1   (row-tiled, bf16 MXU, f32 accum)
# ---------------------------------------------------------------------------
def _project_kernel(x_ref, w_ref, o_ref):
    o_ref[...] = jnp.dot(x_ref[...], w_ref[...],
                         preferred_element_type=jnp.float32).astype(o_ref.dtype)


def _project(x, w, tile):
    n_pad, fp = x.shape
    hp = w.shape[1]
    return pl.pallas_call(
        _project_kernel,
        out_shape=jax.ShapeDtypeStruct((n_pad, hp), jnp.bfloat16),
        grid_spec=pltpu.PrefetchScalarGridSpec(
            num_scalar_prefetch=0,
            grid=(n_pad // tile,),
            in_specs=[pl.BlockSpec((tile, fp), lambda i: (i, 0)),
                      pl.BlockSpec((fp, hp), lambda i: (0, 0))],
            out_specs=pl.BlockSpec((tile, hp), lambda i: (i, 0))),
        compiler_params=pltpu.CompilerParams(
            dimension_semantics=("parallel",),
            vmem_limit_bytes=VMEM_LIMIT),
    )(x, w)


# ---------------------------------------------------------------------------
# Kernel 2: aggregation  H = A_hat @ XW  with fused BN partial statistics.
#   grid = (row tiles, K tiles); f32 accumulator; bf16 h_pre output; per-row-tile
#   partial sum / sum-of-squares outputs (f32) computed from the f32 accumulator.
#   No bias: it is cancelled by BatchNorm's mean subtraction.
# ---------------------------------------------------------------------------
def _agg_finalize(acc_ref, h_ref, sum_ref, ssq_ref):
    acc = acc_ref[...]
    h_ref[...] = acc.astype(h_ref.dtype)
    sum_ref[...] = jnp.sum(acc, axis=0, keepdims=True)[None, :, :]
    ssq_ref[...] = jnp.sum(acc * acc, axis=0, keepdims=True)[None, :, :]


def _aggregate_kernel_resident(a_ref, xw_ref, h_ref, sum_ref, ssq_ref, acc_ref,
                               *, tile_k):
    k = pl.program_id(1)

    @pl.when(k == 0)
    def _():
        acc_ref[...] = jnp.zeros_like(acc_ref)

    off = pl.multiple_of(k * tile_k, tile_k)
    acc_ref[...] += jnp.dot(a_ref[...], xw_ref[pl.ds(off, tile_k), :],
                            preferred_element_type=jnp.float32)

    @pl.when(k == pl.num_programs(1) - 1)
    def _():
        _agg_finalize(acc_ref, h_ref, sum_ref, ssq_ref)


def _aggregate_kernel_stream(a_ref, xw_ref, h_ref, sum_ref, ssq_ref, acc_ref):
    k = pl.program_id(1)

    @pl.when(k == 0)
    def _():
        acc_ref[...] = jnp.zeros_like(acc_ref)

    acc_ref[...] += jnp.dot(a_ref[...], xw_ref[...],
                            preferred_element_type=jnp.float32)

    @pl.when(k == pl.num_programs(1) - 1)
    def _():
        _agg_finalize(acc_ref, h_ref, sum_ref, ssq_ref)


def _aggregate(a, xw, tile_m, tile_k):
    n_pad = a.shape[0]
    hp = xw.shape[1]
    n_row = n_pad // tile_m
    n_k = n_pad // tile_k

    resident = (n_pad * hp * 2) <= XW_RESIDENT_MAX_BYTES
    if resident:
        # XW loaded into VMEM once, sliced per K step (no per-row-tile HBM re-reads).
        xw_spec = pl.BlockSpec((n_pad, hp), lambda i, k: (0, 0))
        kernel = functools.partial(_aggregate_kernel_resident, tile_k=tile_k)
        xw_bytes = n_pad * hp * 2
    else:
        xw_spec = pl.BlockSpec((tile_k, hp), lambda i, k: (k, 0))
        kernel = _aggregate_kernel_stream
        xw_bytes = n_row * n_pad * hp * 2

    flops = 2 * n_pad * n_pad * hp
    bytes_accessed = (n_pad * n_pad * 2        # A_hat bf16, read once
                      + xw_bytes               # XW bf16
                      + n_pad * hp * 2         # bf16 h_pre output
                      + 2 * n_row * hp * 4)    # partial stats (tiny)

    vec3 = pl.BlockSpec((1, 1, hp), lambda i, k: (i, 0, 0))
    return pl.pallas_call(
        kernel,
        out_shape=(jax.ShapeDtypeStruct((n_pad, hp), jnp.bfloat16),
                   jax.ShapeDtypeStruct((n_row, 1, hp), jnp.float32),
                   jax.ShapeDtypeStruct((n_row, 1, hp), jnp.float32)),
        grid_spec=pltpu.PrefetchScalarGridSpec(
            num_scalar_prefetch=0,
            grid=(n_row, n_k),
            in_specs=[pl.BlockSpec((tile_m, tile_k), lambda i, k: (i, k)),
                      xw_spec],
            out_specs=(pl.BlockSpec((tile_m, hp), lambda i, k: (i, 0)),
                       vec3, vec3),
            scratch_shapes=[pltpu.VMEM((tile_m, hp), jnp.float32)]),
        compiler_params=pltpu.CompilerParams(
            dimension_semantics=("parallel", "arbitrary"),
            vmem_limit_bytes=VMEM_LIMIT),
        cost_estimate=pl.CostEstimate(flops=flops, transcendentals=0,
                                      bytes_accessed=bytes_accessed),
    )(a, xw)


# ---------------------------------------------------------------------------
# Kernel 3: fused BN(scale/shift) + ReLU + projection  XW2 = relu(bn(h1)) @ W2
#   (layer-1 activation never hits HBM; BN/ReLU ride the VPU under the MXU/DMA)
# ---------------------------------------------------------------------------
def _bn_relu_project_kernel(h_ref, scale_ref, shift_ref, w_ref, o_ref):
    h = h_ref[...].astype(jnp.float32)
    y = jnp.maximum(h * scale_ref[...] + shift_ref[...], 0.0)
    o_ref[...] = jnp.dot(y.astype(jnp.bfloat16), w_ref[...],
                         preferred_element_type=jnp.float32).astype(o_ref.dtype)


def _bn_relu_project(h, scale, shift, w, tile):
    n_pad, hp = h.shape
    ep = w.shape[1]
    vec = pl.BlockSpec((1, hp), lambda i: (0, 0))
    return pl.pallas_call(
        _bn_relu_project_kernel,
        out_shape=jax.ShapeDtypeStruct((n_pad, ep), jnp.bfloat16),
        grid_spec=pltpu.PrefetchScalarGridSpec(
            num_scalar_prefetch=0,
            grid=(n_pad // tile,),
            in_specs=[pl.BlockSpec((tile, hp), lambda i: (i, 0)),
                      vec, vec,
                      pl.BlockSpec((hp, ep), lambda i: (0, 0))],
            out_specs=pl.BlockSpec((tile, ep), lambda i: (i, 0))),
        compiler_params=pltpu.CompilerParams(
            dimension_semantics=("parallel",),
            vmem_limit_bytes=VMEM_LIMIT),
    )(h, scale, shift, w)


# ---------------------------------------------------------------------------
# Kernel 4: final BN(scale/shift) + ReLU, large row tile (streaming elementwise)
# ---------------------------------------------------------------------------
def _bn_relu_kernel(h_ref, scale_ref, shift_ref, o_ref):
    h = h_ref[...].astype(jnp.float32)
    o_ref[...] = jnp.maximum(h * scale_ref[...] + shift_ref[...],
                             0.0).astype(o_ref.dtype)


def _bn_relu(h, scale, shift, tile, out_dtype):
    n_pad, hp = h.shape
    vec = pl.BlockSpec((1, hp), lambda i: (0, 0))
    row = pl.BlockSpec((tile, hp), lambda i: (i, 0))
    return pl.pallas_call(
        _bn_relu_kernel,
        out_shape=jax.ShapeDtypeStruct((n_pad, hp), out_dtype),
        grid_spec=pltpu.PrefetchScalarGridSpec(
            num_scalar_prefetch=0,
            grid=(n_pad // tile,),
            in_specs=[row, vec, vec],
            out_specs=row),
        compiler_params=pltpu.CompilerParams(
            dimension_semantics=("parallel",),
            vmem_limit_bytes=VMEM_LIMIT),
    )(h, scale, shift)


# ---------------------------------------------------------------------------
# Tiny glue: reduce per-row-tile partial stats to BN scale/shift vectors.
# (Operates on (n_row_tiles, 1, H) f32 partials; negligible XLA work.)
# ---------------------------------------------------------------------------
def _bn_affine(psum, pssq, gamma, beta, n_valid):
    inv_n = 1.0 / float(n_valid)
    s = jnp.sum(psum, axis=0)          # (1, H)
    ss = jnp.sum(pssq, axis=0)         # (1, H)
    mean = s * inv_n
    var = jnp.maximum(ss * inv_n - mean * mean, 0.0)
    scale = gamma * jax.lax.rsqrt(var + EPS)
    shift = beta - mean * scale
    return scale, shift


# ---------------------------------------------------------------------------
# Encoder forward pass (expects a pre-padded bf16 A_hat from prepare_adjacency)
# ---------------------------------------------------------------------------
def prepare_adjacency(a_hat):
    """Pad + cast the dense normalized adjacency once (hoisted out of the forward)."""
    n = a_hat.shape[0]
    n_pad, _, _ = _node_tiling(n)
    return _pad2d(a_hat, n_pad, n_pad, jnp.bfloat16)


def gcn_encoder(a_p, x, params):
    n, f_in = x.shape
    hidden = params["w1"].shape[1]
    emb = params["w2"].shape[1]

    n_pad, tile_m, tile_k = _node_tiling(n)
    assert a_p.shape == (n_pad, n_pad), "a_p must come from prepare_adjacency(a_hat)"
    tile_e = _elem_tile(n_pad, tile_m)

    fp = _round_up(f_in, LANE)
    hp = _round_up(hidden, LANE)
    ep = _round_up(emb, LANE)

    # Small per-call pads/casts (A_hat, the big one, is already pre-padded bf16).
    x_p = _pad2d(x, n_pad, fp, jnp.bfloat16)
    w1_p = _pad2d(params["w1"], fp, hp, jnp.bfloat16)
    w2_p = _pad2d(params["w2"], hp, ep, jnp.bfloat16)
    g1_p = _pad2d(params["gamma1"], 1, hp)
    be1_p = _pad2d(params["beta1"], 1, hp)
    g2_p = _pad2d(params["gamma2"], 1, ep)
    be2_p = _pad2d(params["beta2"], 1, ep)
    # NOTE: conv biases b1/b2 are intentionally unused: BatchNorm's mean subtraction
    # cancels any per-feature constant, so the output is algebraically identical.

    # ---- layer 1: GCNConv (A @ (X @ W1)) with fused BN partial stats ----
    xw1 = _project(x_p, w1_p, tile_m)                        # (n_pad, hp) bf16
    h1_pre, s1, ss1 = _aggregate(a_p, xw1, tile_m, tile_k)   # bf16 + f32 partials
    scale1, shift1 = _bn_affine(s1, ss1, g1_p, be1_p, n)
    # TODO(synk): nn.Dropout(p=0.2) training-mode masking skipped (identity).

    # ---- layer 2: fused BN1+ReLU+projection, then aggregation, then BN2+ReLU ----
    xw2 = _bn_relu_project(h1_pre, scale1, shift1, w2_p, tile_m)   # (n_pad, ep) bf16
    h2_pre, s2, ss2 = _aggregate(a_p, xw2, tile_m, tile_k)
    scale2, shift2 = _bn_affine(s2, ss2, g2_p, be2_p, n)
    out = _bn_relu(h2_pre, scale2, shift2, tile_e, jnp.float32)

    return out[:n, :emb]


# ---------------------------------------------------------------------------
# Plain-JAX glue: graph normalization, params, reference
# ---------------------------------------------------------------------------
def build_normalized_adjacency(edge_index, num_nodes):
    """Dense A_hat = D^{-1/2} (A + I) D^{-1/2} from (2, E) edge_index."""
    src, dst = edge_index[0], edge_index[1]
    adj = jnp.zeros((num_nodes, num_nodes), jnp.float32)
    adj = adj.at[src, dst].set(1.0)
    adj = adj.at[dst, src].set(1.0)                       # undirected
    adj = adj + jnp.eye(num_nodes, dtype=jnp.float32)     # self-loops
    deg = jnp.sum(adj, axis=1)
    d_inv_sqrt = jnp.where(deg > 0, 1.0 / jnp.sqrt(deg), 0.0)
    return adj * d_inv_sqrt[:, None] * d_inv_sqrt[None, :]


def init_params(key, input_dim, hidden_dim, embedding_dim):
    k1, k2 = jax.random.split(key, 2)
    scale1 = 1.0 / jnp.sqrt(jnp.float32(input_dim))
    scale2 = 1.0 / jnp.sqrt(jnp.float32(hidden_dim))
    return {
        "w1": jax.random.normal(k1, (input_dim, hidden_dim), jnp.float32) * scale1,
        "b1": jnp.zeros((1, hidden_dim), jnp.float32),
        "w2": jax.random.normal(k2, (hidden_dim, embedding_dim), jnp.float32) * scale2,
        "b2": jnp.zeros((1, embedding_dim), jnp.float32),
        "gamma1": jnp.ones((1, hidden_dim), jnp.float32),
        "beta1": jnp.zeros((1, hidden_dim), jnp.float32),
        "gamma2": jnp.ones((1, embedding_dim), jnp.float32),
        "beta2": jnp.zeros((1, embedding_dim), jnp.float32),
    }


def gcn_encoder_reference(a_hat, x, params):
    def bn(h, gamma, beta):
        mean = jnp.mean(h, axis=0, keepdims=True)
        var = jnp.mean((h - mean) ** 2, axis=0, keepdims=True)
        return (h - mean) * jax.lax.rsqrt(var + EPS) * gamma + beta

    h1 = a_hat @ (x @ params["w1"]) + params["b1"]
    h1 = jnp.maximum(bn(h1, params["gamma1"], params["beta1"]), 0.0)
    h2 = a_hat @ (h1 @ params["w2"]) + params["b2"]
    return jnp.maximum(bn(h2, params["gamma2"], params["beta2"]), 0.0)


if __name__ == "__main__":
    key = jax.random.PRNGKey(0)
    k_x, k_e, k_p = jax.random.split(key, 3)

    num_nodes = 32
    input_dim, hidden_dim, embedding_dim = 16, 32, 16
    num_edges = 64

    x = jax.random.normal(k_x, (num_nodes, input_dim), jnp.float32)
    edge_index = jax.random.randint(k_e, (2, num_edges), 0, num_nodes, jnp.int32)

    a_hat = build_normalized_adjacency(edge_index, num_nodes)
    a_p = prepare_adjacency(a_hat)          # pad + bf16 cast hoisted out of the forward
    params = init_params(k_p, input_dim, hidden_dim, embedding_dim)

    embeddings = jax.jit(gcn_encoder)(a_p, x, params)
    jax.block_until_ready(embeddings)

    assert embeddings.shape == (num_nodes, embedding_dim)
    assert bool(jnp.all(jnp.isfinite(embeddings)))

    # Loose sanity check vs. a plain-JAX f32 reference (kernel feeds the MXU bf16 and
    # keeps intermediates bf16; reference keeps the BN-cancelled biases).
    ref = gcn_encoder_reference(a_hat, x, params)
    max_err = float(jnp.max(jnp.abs(embeddings - ref)))
    assert max_err < 0.3, f"max |kernel - reference| too large: {max_err}"

    print("KERNEL_OK")
</pallas_src>

<mosaic_0001>
module attributes {stable_mosaic.version = 11 : i64} {
  func.func @_project_kernel(%arg0: i32, %arg1: memref<32x128xbf16, #tpu.memory_space<vmem>>, %arg2: memref<128x128xbf16, #tpu.memory_space<vmem>>, %arg3: memref<32x128xbf16, #tpu.memory_space<vmem>>) attributes {dimension_semantics = [#tpu.dimension_semantics<parallel>], iteration_bounds = array<i64: 1>, scalar_prefetch = 0 : i64, scratch_operands = 0 : i64, tpu.core_type = #tpu.core_type<tc>, window_params = [{transform_indices = @transform_0, window_bounds = array<i64: 32, 128>}, {pipeline_mode = #tpu.pipeline_mode<synchronous>, transform_indices = @transform_1, window_bounds = array<i64: 128, 128>}, {transform_indices = @transform_2, window_bounds = array<i64: 32, 128>}]} {
    %c0 = arith.constant 0 : index
    %c0_0 = arith.constant 0 : index
    %0 = vector.load %arg1[%c0, %c0_0] : memref<32x128xbf16, #tpu.memory_space<vmem>>, vector<32x128xbf16>
    %c0_1 = arith.constant 0 : index
    %c0_2 = arith.constant 0 : index
    %1 = vector.load %arg2[%c0_1, %c0_2] : memref<128x128xbf16, #tpu.memory_space<vmem>>, vector<128x128xbf16>
    %cst = arith.constant dense<0.000000e+00> : vector<32x128xf32>
    %2 = tpu.matmul %0, %1, %cst {dimension_numbers = #tpu.dot_dimension_numbers<[1], [0], [0], [1], [0, 0, 1, 1], [], []>} : vector<32x128xbf16>, vector<128x128xbf16>, vector<32x128xf32> -> vector<32x128xf32>
    %3 = arith.truncf %2 : vector<32x128xf32> to vector<32x128xbf16>
    %c0_3 = arith.constant 0 : index
    %c0_4 = arith.constant 0 : index
    %4 = vector.load %arg3[%c0_3, %c0_4] : memref<32x128xbf16, #tpu.memory_space<vmem>>, vector<32x128xbf16>
    tpu.vector_store %arg3[%c0_3, %c0_4], %3 {strides = array<i32>} : memref<32x128xbf16, #tpu.memory_space<vmem>>, vector<32x128xbf16>,
    return
  }
  func.func @transform_0(%arg0: i32) -> (i32, i32) {
    %c0_i32 = arith.constant 0 : i32
    %c0_i32_0 = arith.constant 0 : i32
    return %arg0, %c0_i32 : i32, i32
  }
  func.func @transform_1(%arg0: i32) -> (i32, i32) {
    %c0_i32 = arith.constant 0 : i32
    %c0_i32_0 = arith.constant 0 : i32
    %c0_i32_1 = arith.constant 0 : i32
    return %c0_i32, %c0_i32_0 : i32, i32
  }
  func.func @transform_2(%arg0: i32) -> (i32, i32) {
    %c0_i32 = arith.constant 0 : i32
    %c0_i32_0 = arith.constant 0 : i32
    return %arg0, %c0_i32 : i32, i32
  }
}

module attributes {stable_mosaic.version = 11 : i64} {
  func.func @_aggregate_kernel_resident(%arg0: i32, %arg1: i32, %arg2: memref<32x32xbf16, #tpu.memory_space<vmem>>, %arg3: memref<32x128xbf16, #tpu.memory_space<vmem>>, %arg4: memref<32x128xbf16, #tpu.memory_space<vmem>>, %arg5: memref<1x1x128xf32, #tpu.memory_space<vmem>>, %arg6: memref<1x1x128xf32, #tpu.memory_space<vmem>>, %arg7: memref<32x128xf32, #tpu.memory_space<vmem>>) attributes {dimension_semantics = [#tpu.dimension_semantics<parallel>, #tpu.dimension_semantics<arbitrary>], iteration_bounds = array<i64: 1, 1>, scalar_prefetch = 0 : i64, scratch_operands = 1 : i64, tpu.core_type = #tpu.core_type<tc>, window_params = [{transform_indices = @transform_0, window_bounds = array<i64: 32, 32>}, {pipeline_mode = #tpu.pipeline_mode<synchronous>, transform_indices = @transform_1, window_bounds = array<i64: 32, 128>}, {transform_indices = @transform_2, window_bounds = array<i64: 32, 128>}, {transform_indices = @transform_3, window_bounds = array<i64: 1, 1, 128>}, {transform_indices = @transform_4, window_bounds = array<i64: 1, 1, 128>}]} {
    %c0_i32 = arith.constant 0 : i32
    %0 = arith.cmpi eq, %arg1, %c0_i32 : i32
    %1 = arith.extui %0 : i1 to i32
    %c0_i32_0 = arith.constant 0 : i32
    %2 = arith.cmpi ne, %1, %c0_i32_0 : i32
    scf.if %2 {
      %cst_9 = arith.constant 0.000000e+00 : f32
      %15 = vector.broadcast %cst_9 : f32 to vector<32x128xf32>
      %c0_10 = arith.constant 0 : index
      %c0_11 = arith.constant 0 : index
      %16 = vector.load %arg7[%c0_10, %c0_11] : memref<32x128xf32, #tpu.memory_space<vmem>>, vector<32x128xf32>
      tpu.vector_store %arg7[%c0_10, %c0_11], %15 {strides = array<i32>} : memref<32x128xf32, #tpu.memory_space<vmem>>, vector<32x128xf32>,
    } else {
    }
    %c32_i32 = arith.constant 32 : i32
    %3 = arith.muli %arg1, %c32_i32 : i32
    %4 = tpu.assume_multiple %3, 32 : i32
    %c0 = arith.constant 0 : index
    %c0_1 = arith.constant 0 : index
    %5 = vector.load %arg7[%c0, %c0_1] : memref<32x128xf32, #tpu.memory_space<vmem>>, vector<32x128xf32>
    %c0_2 = arith.constant 0 : index
    %c0_3 = arith.constant 0 : index
    %6 = vector.load %arg2[%c0_2, %c0_3] : memref<32x32xbf16, #tpu.memory_space<vmem>>, vector<32x32xbf16>
    %7 = arith.index_cast %4 : i32 to index
    %c0_4 = arith.constant 0 : index
    %8 = vector.load %arg3[%7, %c0_4] : memref<32x128xbf16, #tpu.memory_space<vmem>>, vector<32x128xbf16>
    %cst = arith.constant dense<0.000000e+00> : vector<32x128xf32>
    %9 = tpu.matmul %6, %8, %cst {dimension_numbers = #tpu.dot_dimension_numbers<[1], [0], [0], [1], [0, 0, 1, 1], [], []>} : vector<32x32xbf16>, vector<32x128xbf16>, vector<32x128xf32> -> vector<32x128xf32>
    %10 = arith.addf %5, %9 : vector<32x128xf32>
    %c0_5 = arith.constant 0 : index
    %c0_6 = arith.constant 0 : index
    %11 = vector.load %arg7[%c0_5, %c0_6] : memref<32x128xf32, #tpu.memory_space<vmem>>, vector<32x128xf32>
    tpu.vector_store %arg7[%c0_5, %c0_6], %10 {strides = array<i32>} : memref<32x128xf32, #tpu.memory_space<vmem>>, vector<32x128xf32>,
    %c0_i32_7 = arith.constant 0 : i32
    %12 = arith.cmpi eq, %arg1, %c0_i32_7 : i32
    %13 = arith.extui %12 : i1 to i32
    %c0_i32_8 = arith.constant 0 : i32
    %14 = arith.cmpi ne, %13, %c0_i32_8 : i32
    scf.if %14 {
      %c0_9 = arith.constant 0 : index
      %c0_10 = arith.constant 0 : index
      %15 = vector.load %arg7[%c0_9, %c0_10] : memref<32x128xf32, #tpu.memory_space<vmem>>, vector<32x128xf32>
      %16 = arith.truncf %15 : vector<32x128xf32> to vector<32x128xbf16>
      %c0_11 = arith.constant 0 : index
      %c0_12 = arith.constant 0 : index
      %17 = vector.load %arg4[%c0_11, %c0_12] : memref<32x128xbf16, #tpu.memory_space<vmem>>, vector<32x128xbf16>
      tpu.vector_store %arg4[%c0_11, %c0_12], %16 {strides = array<i32>} : memref<32x128xbf16, #tpu.memory_space<vmem>>, vector<32x128xbf16>,
      %cst_13 = arith.constant dense<0.000000e+00> : vector<128xf32>
      %18 = vector.multi_reduction <add>, %15, %cst_13 [0] : vector<32x128xf32> to vector<128xf32>
      %19 = vector.shape_cast %18 : vector<128xf32> to vector<1x128xf32>
      %20 = vector.shape_cast %19 : vector<1x128xf32> to vector<1x1x128xf32>
      %c0_14 = arith.constant 0 : index
      %c0_15 = arith.constant 0 : index
      %c0_16 = arith.constant 0 : index
      %21 = vector.load %arg5[%c0_14, %c0_15, %c0_16] : memref<1x1x128xf32, #tpu.memory_space<vmem>>, vector<1x1x128xf32>
      tpu.vector_store %arg5[%c0_14, %c0_15, %c0_16], %20 {strides = array<i32>} : memref<1x1x128xf32, #tpu.memory_space<vmem>>, vector<1x1x128xf32>,
      %22 = arith.mulf %15, %15 : vector<32x128xf32>
      %cst_17 = arith.constant dense<0.000000e+00> : vector<128xf32>
      %23 = vector.multi_reduction <add>, %22, %cst_17 [0] : vector<32x128xf32> to vector<128xf32>
      %24 = vector.shape_cast %23 : vector<128xf32> to vector<1x128xf32>
      %25 = vector.shape_cast %24 : vector<1x128xf32> to vector<1x1x128xf32>
      %c0_18 = arith.constant 0 : index
      %c0_19 = arith.constant 0 : index
      %c0_20 = arith.constant 0 : index
      %26 = vector.load %arg6[%c0_18, %c0_19, %c0_20] : memref<1x1x128xf32, #tpu.memory_space<vmem>>, vector<1x1x128xf32>
      tpu.vector_store %arg6[%c0_18, %c0_19, %c0_20], %25 {strides = array<i32>} : memref<1x1x128xf32, #tpu.memory_space<vmem>>, vector<1x1x128xf32>,
    } else {
    }
    return
  }
  func.func @transform_0(%arg0: i32, %arg1: i32) -> (i32, i32) {
    %c0_i32 = arith.constant 0 : i32
    return %arg0, %arg1 : i32, i32
  }
  func.func @transform_1(%arg0: i32, %arg1: i32) -> (i32, i32) {
    %c0_i32 = arith.constant 0 : i32
    %c0_i32_0 = arith.constant 0 : i32
    %c0_i32_1 = arith.constant 0 : i32
    return %c0_i32, %c0_i32_0 : i32, i32
  }
  func.func @transform_2(%arg0: i32, %arg1: i32) -> (i32, i32) {
    %c0_i32 = arith.constant 0 : i32
    %c0_i32_0 = arith.constant 0 : i32
    return %arg0, %c0_i32 : i32, i32
  }
  func.func @transform_3(%arg0: i32, %arg1: i32) -> (i32, i32, i32) {
    %c0_i32 = arith.constant 0 : i32
    %c0_i32_0 = arith.constant 0 : i32
    %c0_i32_1 = arith.constant 0 : i32
    return %arg0, %c0_i32, %c0_i32_0 : i32, i32, i32
  }
  func.func @transform_4(%arg0: i32, %arg1: i32) -> (i32, i32, i32) {
    %c0_i32 = arith.constant 0 : i32
    %c0_i32_0 = arith.constant 0 : i32
    %c0_i32_1 = arith.constant 0 : i32
    return %arg0, %c0_i32, %c0_i32_0 : i32, i32, i32
  }
}

module attributes {stable_mosaic.version = 11 : i64} {
  func.func @_bn_relu_project_kernel(%arg0: i32, %arg1: memref<32x128xbf16, #tpu.memory_space<vmem>>, %arg2: memref<1x128xf32, #tpu.memory_space<vmem>>, %arg3: memref<1x128xf32, #tpu.memory_space<vmem>>, %arg4: memref<128x128xbf16, #tpu.memory_space<vmem>>, %arg5: memref<32x128xbf16, #tpu.memory_space<vmem>>) attributes {dimension_semantics = [#tpu.dimension_semantics<parallel>], iteration_bounds = array<i64: 1>, scalar_prefetch = 0 : i64, scratch_operands = 0 : i64, tpu.core_type = #tpu.core_type<tc>, window_params = [{transform_indices = @transform_0, window_bounds = array<i64: 32, 128>}, {pipeline_mode = #tpu.pipeline_mode<synchronous>, transform_indices = @transform_1, window_bounds = array<i64: 1, 128>}, {pipeline_mode = #tpu.pipeline_mode<synchronous>, transform_indices = @transform_2, window_bounds = array<i64: 1, 128>}, {pipeline_mode = #tpu.pipeline_mode<synchronous>, transform_indices = @transform_3, window_bounds = array<i64: 128, 128>}, {transform_indices = @transform_4, window_bounds = array<i64: 32, 128>}]} {
    %c0 = arith.constant 0 : index
    %c0_0 = arith.constant 0 : index
    %0 = vector.load %arg1[%c0, %c0_0] : memref<32x128xbf16, #tpu.memory_space<vmem>>, vector<32x128xbf16>
    %1 = arith.extf %0 : vector<32x128xbf16> to vector<32x128xf32>
    %c0_1 = arith.constant 0 : index
    %c0_2 = arith.constant 0 : index
    %2 = vector.load %arg2[%c0_1, %c0_2] : memref<1x128xf32, #tpu.memory_space<vmem>>, vector<1x128xf32>
    %3 = vector.broadcast %2 : vector<1x128xf32> to vector<32x128xf32>
    %4 = arith.mulf %1, %3 : vector<32x128xf32>
    %c0_3 = arith.constant 0 : index
    %c0_4 = arith.constant 0 : index
    %5 = vector.load %arg3[%c0_3, %c0_4] : memref<1x128xf32, #tpu.memory_space<vmem>>, vector<1x128xf32>
    %6 = vector.broadcast %5 : vector<1x128xf32> to vector<32x128xf32>
    %7 = arith.addf %4, %6 : vector<32x128xf32>
    %cst = arith.constant 0.000000e+00 : f32
    %8 = vector.broadcast %cst : f32 to vector<32x128xf32>
    %9 = arith.maximumf %7, %8 : vector<32x128xf32>
    %10 = arith.truncf %9 : vector<32x128xf32> to vector<32x128xbf16>
    %c0_5 = arith.constant 0 : index
    %c0_6 = arith.constant 0 : index
    %11 = vector.load %arg4[%c0_5, %c0_6] : memref<128x128xbf16, #tpu.memory_space<vmem>>, vector<128x128xbf16>
    %cst_7 = arith.constant dense<0.000000e+00> : vector<32x128xf32>
    %12 = tpu.matmul %10, %11, %cst_7 {dimension_numbers = #tpu.dot_dimension_numbers<[1], [0], [0], [1], [0, 0, 1, 1], [], []>} : vector<32x128xbf16>, vector<128x128xbf16>, vector<32x128xf32> -> vector<32x128xf32>
    %13 = arith.truncf %12 : vector<32x128xf32> to vector<32x128xbf16>
    %c0_8 = arith.constant 0 : index
    %c0_9 = arith.constant 0 : index
    %14 = vector.load %arg5[%c0_8, %c0_9] : memref<32x128xbf16, #tpu.memory_space<vmem>>, vector<32x128xbf16>
    tpu.vector_store %arg5[%c0_8, %c0_9], %13 {strides = array<i32>} : memref<32x128xbf16, #tpu.memory_space<vmem>>, vector<32x128xbf16>,
    return
  }
  func.func @transform_0(%arg0: i32) -> (i32, i32) {
    %c0_i32 = arith.constant 0 : i32
    %c0_i32_0 = arith.constant 0 : i32
    return %arg0, %c0_i32 : i32, i32
  }
  func.func @transform_1(%arg0: i32) -> (i32, i32) {
    %c0_i32 = arith.constant 0 : i32
    %c0_i32_0 = arith.constant 0 : i32
    %c0_i32_1 = arith.constant 0 : i32
    return %c0_i32, %c0_i32_0 : i32, i32
  }
  func.func @transform_2(%arg0: i32) -> (i32, i32) {
    %c0_i32 = arith.constant 0 : i32
    %c0_i32_0 = arith.constant 0 : i32
    %c0_i32_1 = arith.constant 0 : i32
    return %c0_i32, %c0_i32_0 : i32, i32
  }
  func.func @transform_3(%arg0: i32) -> (i32, i32) {
    %c0_i32 = arith.constant 0 : i32
    %c0_i32_0 = arith.constant 0 : i32
    %c0_i32_1 = arith.constant 0 : i32
    return %c0_i32, %c0_i32_0 : i32, i32
  }
  func.func @transform_4(%arg0: i32) -> (i32, i32) {
    %c0_i32 = arith.constant 0 : i32
    %c0_i32_0 = arith.constant 0 : i32
    return %arg0, %c0_i32 : i32, i32
  }
}

module attributes {stable_mosaic.version = 11 : i64} {
  func.func @_bn_relu_kernel(%arg0: i32, %arg1: memref<32x128xbf16, #tpu.memory_space<vmem>>, %arg2: memref<1x128xf32, #tpu.memory_space<vmem>>, %arg3: memref<1x128xf32, #tpu.memory_space<vmem>>, %arg4: memref<32x128xf32, #tpu.memory_space<vmem>>) attributes {dimension_semantics = [#tpu.dimension_semantics<parallel>], iteration_bounds = array<i64: 1>, scalar_prefetch = 0 : i64, scratch_operands = 0 : i64, tpu.core_type = #tpu.core_type<tc>, window_params = [{transform_indices = @transform_0, window_bounds = array<i64: 32, 128>}, {pipeline_mode = #tpu.pipeline_mode<synchronous>, transform_indices = @transform_1, window_bounds = array<i64: 1, 128>}, {pipeline_mode = #tpu.pipeline_mode<synchronous>, transform_indices = @transform_2, window_bounds = array<i64: 1, 128>}, {transform_indices = @transform_3, window_bounds = array<i64: 32, 128>}]} {
    %c0 = arith.constant 0 : index
    %c0_0 = arith.constant 0 : index
    %0 = vector.load %arg1[%c0, %c0_0] : memref<32x128xbf16, #tpu.memory_space<vmem>>, vector<32x128xbf16>
    %1 = arith.extf %0 : vector<32x128xbf16> to vector<32x128xf32>
    %c0_1 = arith.constant 0 : index
    %c0_2 = arith.constant 0 : index
    %2 = vector.load %arg2[%c0_1, %c0_2] : memref<1x128xf32, #tpu.memory_space<vmem>>, vector<1x128xf32>
    %3 = vector.broadcast %2 : vector<1x128xf32> to vector<32x128xf32>
    %4 = arith.mulf %1, %3 : vector<32x128xf32>
    %c0_3 = arith.constant 0 : index
    %c0_4 = arith.constant 0 : index
    %5 = vector.load %arg3[%c0_3, %c0_4] : memref<1x128xf32, #tpu.memory_space<vmem>>, vector<1x128xf32>
    %6 = vector.broadcast %5 : vector<1x128xf32> to vector<32x128xf32>
    %7 = arith.addf %4, %6 : vector<32x128xf32>
    %cst = arith.constant 0.000000e+00 : f32
    %8 = vector.broadcast %cst : f32 to vector<32x128xf32>
    %9 = arith.maximumf %7, %8 : vector<32x128xf32>
    %c0_5 = arith.constant 0 : index
    %c0_6 = arith.constant 0 : index
    %10 = vector.load %arg4[%c0_5, %c0_6] : memref<32x128xf32, #tpu.memory_space<vmem>>, vector<32x128xf32>
    tpu.vector_store %arg4[%c0_5, %c0_6], %9 {strides = array<i32>} : memref<32x128xf32, #tpu.memory_space<vmem>>, vector<32x128xf32>,
    return
  }
  func.func @transform_0(%arg0: i32) -> (i32, i32) {
    %c0_i32 = arith.constant 0 : i32
    %c0_i32_0 = arith.constant 0 : i32
    return %arg0, %c0_i32 : i32, i32
  }
  func.func @transform_1(%arg0: i32) -> (i32, i32) {
    %c0_i32 = arith.constant 0 : i32
    %c0_i32_0 = arith.constant 0 : i32
    %c0_i32_1 = arith.constant 0 : i32
    return %c0_i32, %c0_i32_0 : i32, i32
  }
  func.func @transform_2(%arg0: i32) -> (i32, i32) {
    %c0_i32 = arith.constant 0 : i32
    %c0_i32_0 = arith.constant 0 : i32
    %c0_i32_1 = arith.constant 0 : i32
    return %c0_i32, %c0_i32_0 : i32, i32
  }
  func.func @transform_3(%arg0: i32) -> (i32, i32) {
    %c0_i32 = arith.constant 0 : i32
    %c0_i32_0 = arith.constant 0 : i32
    return %arg0, %c0_i32 : i32, i32
  }
}

</mosaic_0001>

<bundles_post_ra>
// kernel: gcn_encoder.9
= control target key start
LH: loop header
LB: loop body
LE: loop exit
PB: predicated region body
PF: predicated region fallthrough
CT: control target
= control target key end

     0   :  { %s111_s0 = inlined_call_operand.vmem [shape: bf16[32,128], index: 0, kind: input, shape index: {}]   ;;  %s112_s1 = inlined_call_operand.vmem [shape: f32[1,128], index: 1, kind: input, shape index: {}]   ;;  %s113_s2 = inlined_call_operand.vmem [shape: f32[1,128], index: 2, kind: input, shape index: {}]   ;;  %s114_s3 = inlined_call_operand.vmem [shape: f32[32,128], index: 3, kind: output, shape index: {}]  }
   0x1   :  { %v59_v0 = vld [vmem:[%s111_s0] sm:$0xff]   ;;  %v66_v4 = vld [vmem:[%s111_s0 + $0x8] sm:$0xff]  }
   0x2   :  { %v56_v1 = vld [vmem:[%s112_s1] ss:$0 sm:$0xff]  ;;  %v60_v2 = vunpack.c.l.bf16 %v59_v0  ;;  %v61_v3 = vunpack.c.h.bf16 %v59_v0  ;;  %v64_v6 = vunpack.c.l.bf16 %v66_v4  ;;  %v65_v7 = vunpack.c.h.bf16 %v66_v4 }
   0x3   :  { %v57_v5 = vld [vmem:[%s113_s2] ss:$0 sm:$0xff] }
   0x4   :  { %v29_v8 = vmul.f32 %v60_v2, %v56_v1  ;;  %v30_v9 = vmul.f32 %v61_v3, %v56_v1  ;;  %v31_v10 = vmul.f32 %v64_v6, %v56_v1  ;;  %v32_v11 = vmul.f32 %v65_v7, %v56_v1 }
   0x6   :  { %v40_v12 = vadd.f32 %v57_v5, %v29_v8  ;;  %v41_v13 = vadd.f32 %v57_v5, %v30_v9  ;;  %v42_v14 = vadd.f32 %v57_v5, %v31_v10  ;;  %v43_v15 = vadd.f32 %v57_v5, %v32_v11 }
   0x8   :  { %v44_v16 = vmax.f32 %v40_v12, 0.0  ;;  %v45_v17 = vmax.f32 %v41_v13, 0.0  ;;  %v46_v18 = vmax.f32 %v42_v14, 0.0  ;;  %v47_v19 = vmax.f32 %v43_v15, 0.0 }
   0xa   :  { %48 = vst [vmem:[%s114_s3] sm:$0xff] %v44_v16  ;;  %49 = vst [vmem:[%s114_s3 + $0x8] sm:$0xff] %v45_v17 }
   0xb   :  { %50 = vst [vmem:[%s114_s3 + $0x10] sm:$0xff] %v46_v18  ;;  %51 = vst [vmem:[%s114_s3 + $0x18] sm:$0xff] %v47_v19 }

// kernel: gcn_encoder.7
= control target key start
LH: loop header
LB: loop body
LE: loop exit
PB: predicated region body
PF: predicated region fallthrough
CT: control target
= control target key end

     0   :  { %s334_s3 = inlined_call_operand.vmem [shape: bf16[128,128], index: 3, kind: input, shape index: {}]   ;;  %s335_s0 = inlined_call_operand.vmem [shape: bf16[32,128], index: 0, kind: input, shape index: {}]   ;;  %s336_s1 = inlined_call_operand.vmem [shape: f32[1,128], index: 1, kind: input, shape index: {}]   ;;  %s337_s2 = inlined_call_operand.vmem [shape: f32[1,128], index: 2, kind: input, shape index: {}]   ;;  %s338_s4 = inlined_call_operand.vmem [shape: bf16[32,128], index: 4, kind: output, shape index: {}]  }
   0x1   :  { %v259_v0 = vld [vmem:[%s334_s3] sm:$0xff]   ;;  %v260_v1 = vld [vmem:[%s334_s3 + $0x8] sm:$0xff]   ;;  %v261_v2 = vld [vmem:[%s334_s3 + $0x10] sm:$0xff]  }
   0x2   :  { %239 = vmatprep.subr.bf16.mxu0 %v259_v0  ;;  %v262_v3 = vld [vmem:[%s334_s3 + $0x18] sm:$0xff]   ;;  %v210_v4 = vld [vmem:[%s335_s0] sm:$0xff]   ;;  %v227_v9 = vld [vmem:[%s335_s0 + $0x8] sm:$0xff]  }
   0x3   :  { %240 = vmatpush3.bf16.msra.mxu0 %v259_v0  ;;  %v191_v5 = vld [vmem:[%s336_s1] ss:$0 sm:$0xff]  ;;  %v211_v6 = vunpack.c.l.bf16 %v210_v4  ;;  %v212_v7 = vunpack.c.h.bf16 %v210_v4  ;;  %v215_v15 = vunpack.c.l.bf16 %v227_v9  ;;  %v216_v16 = vunpack.c.h.bf16 %v227_v9  ;;  %v264_v19 = vld [vmem:[%s334_s3 + $0x28] sm:$0xff]   ;;  %v265_v23 = vld [vmem:[%s334_s3 + $0x30] sm:$0xff]  }
   0x4   :  { %241 = vmatprep.subr.bf16.mxu0 %v260_v1  ;;  %v192_v8 = vld [vmem:[%s337_s2] ss:$0 sm:$0xff]  ;;  %v266_v26 = vld [vmem:[%s334_s3 + $0x38] sm:$0xff]  }
   0x5   :  { %v33_v10 = vmul.f32 %v211_v6, %v191_v5  ;;  %v34_v11 = vmul.f32 %v212_v7, %v191_v5  ;;  %v263_v12 = vld [vmem:[%s334_s3 + $0x20] sm:$0xff]   ;;  %v35_v21 = vmul.f32 %v215_v15, %v191_v5  ;;  %v36_v22 = vmul.f32 %v216_v16, %v191_v5 }
   0x7   :  { %242 = vmatpush3.bf16.msra.mxu0 %v260_v1  ;;  %v44_v13 = vadd.f32 %v192_v8, %v33_v10  ;;  %v45_v14 = vadd.f32 %v192_v8, %v34_v11  ;;  %v46_v24 = vadd.f32 %v192_v8, %v35_v21  ;;  %v47_v25 = vadd.f32 %v192_v8, %v36_v22 }
   0x8   :  { %243 = vmatprep.subr.bf16.mxu0 %v261_v2 }
   0x9   :  { %v48_v17 = vmax.f32 %v44_v13, 0.0  ;;  %v49_v18 = vmax.f32 %v45_v14, 0.0  ;;  %v50_v27 = vmax.f32 %v46_v24, 0.0  ;;  %v51_v28 = vmax.f32 %v47_v25, 0.0 }
   0xb   :  { %244 = vmatpush3.bf16.msra.mxu0 %v261_v2  ;;  %v52_v20 = vpack.c.bf16 %v49_v18, %v48_v17  ;;  %v53_v29 = vpack.c.bf16 %v51_v28, %v50_v27 }
   0xc   :  { %245 = vmatprep.subr.bf16.mxu0 %v262_v3 }
   0xd   :  { %255 = vmatprep.mubr.bf16.mxu0 %v52_v20 }
   0xf   :  { %246 = vmatpush3.bf16.msra.mxu0 %v262_v3 }
  0x10   :  { %247 = vmatprep.subr.bf16.mxu0 %v263_v12 }
  0x13   :  { %248 = vmatpush3.bf16.msra.mxu0 %v263_v12 }
  0x14   :  { %249 = vmatprep.subr.bf16.mxu0 %v264_v19 }
  0x17   :  { %250 = vmatpush3.bf16.msra.mxu0 %v264_v19 }
  0x18   :  { %251 = vmatprep.subr.bf16.mxu0 %v265_v23 }
  0x1b   :  { %252 = vmatpush3.bf16.msra.mxu0 %v265_v23 }
  0x1c   :  { %253 = vmatprep.subr.bf16.mxu0 %v266_v26 }
  0x1f   :  { %254 = vmatpush3.bf16.msra.mxu0 %v266_v26 }
  0x22   :  { %256 = vmatmul.mubr.bf16.vlgmr.msra.gmra.mrb[0].mxu0 %v53_v29 }
  0xf5   :  { %v257_v30 = vpop.f32.mrb[0].mxu0 }
  0xf6   :  { %v152_v31 = vpop.f32.mrb[1].mxu0 }
  0xf7   :  { %v258_v32 = vpop.f32.mrb[2].mxu0 }
  0xf8   :  { %v225_v33 = vpack.c.bf16 %v258_v32, %v257_v30  ;;  %v155_v34 = vpop.f32.mrb[3].mxu0 }
  0xf9   :  { %v220_v35 = vpack.c.bf16 %v155_v34, %v152_v31 }
  0xfa   :  { %228 = vst [vmem:[%s338_s4 + $0x8] sm:$0xff] %v225_v33  }
  0xfb   :  { %221 = vst [vmem:[%s338_s4] sm:$0xff] %v220_v35  }

// kernel: gcn_encoder.5
= control target key start
LH: loop header
LB: loop body
LE: loop exit
PB: predicated region body
PF: predicated region fallthrough
CT: control target
= control target key end

     0   :  { %s285_s1 = inlined_call_operand.vmem [shape: bf16[128,128], index: 1, kind: input, shape index: {}]   ;;  %s286_s0 = inlined_call_operand.vmem [shape: bf16[32,128], index: 0, kind: input, shape index: {}]   ;;  %s287_s2 = inlined_call_operand.vmem [shape: bf16[32,128], index: 2, kind: output, shape index: {}]  }
   0x1   :  { %v224_v0 = vld [vmem:[%s285_s1] sm:$0xff]   ;;  %v225_v1 = vld [vmem:[%s285_s1 + $0x8] sm:$0xff]   ;;  %v226_v2 = vld [vmem:[%s285_s1 + $0x10] sm:$0xff]  }
   0x2   :  { %204 = vmatprep.subr.bf16.mxu0 %v224_v0  ;;  %v227_v3 = vld [vmem:[%s285_s1 + $0x18] sm:$0xff]   ;;  %v232_v4 = vld [vmem:[%s286_s0] sm:$0xff]   ;;  %v229_v6 = vld [vmem:[%s285_s1 + $0x28] sm:$0xff]  }
   0x3   :  { %205 = vmatpush3.bf16.msra.mxu0 %v224_v0  ;;  %220 = vmatprep.mubr.bf16.mxu0 %v232_v4  ;;  %v228_v5 = vld [vmem:[%s285_s1 + $0x20] sm:$0xff]   ;;  %v230_v7 = vld [vmem:[%s285_s1 + $0x30] sm:$0xff]   ;;  %v231_v8 = vld [vmem:[%s285_s1 + $0x38] sm:$0xff]  }
   0x4   :  { %206 = vmatprep.subr.bf16.mxu0 %v225_v1  ;;  %v233_v9 = vld [vmem:[%s286_s0 + $0x8] sm:$0xff]  }
   0x7   :  { %207 = vmatpush3.bf16.msra.mxu0 %v225_v1 }
   0x8   :  { %208 = vmatprep.subr.bf16.mxu0 %v226_v2 }
   0xb   :  { %209 = vmatpush3.bf16.msra.mxu0 %v226_v2 }
   0xc   :  { %210 = vmatprep.subr.bf16.mxu0 %v227_v3 }
   0xf   :  { %211 = vmatpush3.bf16.msra.mxu0 %v227_v3 }
  0x10   :  { %212 = vmatprep.subr.bf16.mxu0 %v228_v5 }
  0x13   :  { %213 = vmatpush3.bf16.msra.mxu0 %v228_v5 }
  0x14   :  { %214 = vmatprep.subr.bf16.mxu0 %v229_v6 }
  0x17   :  { %215 = vmatpush3.bf16.msra.mxu0 %v229_v6 }
  0x18   :  { %216 = vmatprep.subr.bf16.mxu0 %v230_v7 }
  0x1b   :  { %217 = vmatpush3.bf16.msra.mxu0 %v230_v7 }
  0x1c   :  { %218 = vmatprep.subr.bf16.mxu0 %v231_v8 }
  0x1f   :  { %219 = vmatpush3.bf16.msra.mxu0 %v231_v8 }
  0x22   :  { %221 = vmatmul.mubr.bf16.vlgmr.msra.gmra.mrb[0].mxu0 %v233_v9 }
  0xf5   :  { %v222_v10 = vpop.f32.mrb[0].mxu0 }
  0xf6   :  { %v126_v11 = vpop.f32.mrb[1].mxu0 }
  0xf7   :  { %v223_v12 = vpop.f32.mrb[2].mxu0 }
  0xf8   :  { %v191_v13 = vpack.c.bf16 %v223_v12, %v222_v10  ;;  %v129_v14 = vpop.f32.mrb[3].mxu0 }
  0xf9   :  { %v186_v15 = vpack.c.bf16 %v129_v14, %v126_v11 }
  0xfa   :  { %193 = vst [vmem:[%s287_s2 + $0x8] sm:$0xff] %v191_v13  }
  0xfb   :  { %187 = vst [vmem:[%s287_s2] sm:$0xff] %v186_v15  }

// kernel: gcn_encoder.6
= control target key start
LH: loop header
LB: loop body
LE: loop exit
PB: predicated region body
PF: predicated region fallthrough
CT: control target
= control target key end

     0   :  { %vm62_vm0 = vcmask 261120   ;;  %s281_s1 = inlined_call_operand.vmem [shape: bf16[32,128], index: 1, kind: input, shape index: {}]   ;;  %s282_s0 = inlined_call_operand.vmem [shape: bf16[32,32], index: 0, kind: input, shape index: {}]   ;;  %s283_s2 = inlined_call_operand.vmem [shape: bf16[32,128], index: 2, kind: output, shape index: {0}]   ;;  %s284_s3 = inlined_call_operand.vmem [shape: f32[1,1,128], index: 3, kind: output, shape index: {1}]   ;;  %s285_s4 = inlined_call_operand.vmem [shape: f32[1,1,128], index: 4, kind: output, shape index: {2}]  }
   0x1   :  { %v228_v0 = vld [vmem:[%s281_s1] sm:$0xff]   ;;  %v229_v1 = vld [vmem:[%s281_s1 + $0x8] sm:$0xff]  }
   0x2   :  { %220 = vmatprep.subr.bf16.mxu0 %v228_v0  ;;  %v230_v2 = vld [vmem:[%s282_s0] sm:$0xff]   ;;  %v231_v3 = vld [vmem:[%s282_s0 + $0x8] sm:$0xff]  }
   0x3   :  { %221 = vmatpush3.bf16.msra.mxu0 %v228_v0  ;;  %224 = vmatprep.mubr.msk.bf16.mxu0 %vm62_vm0, %v230_v2 }
   0x4   :  { %222 = vmatprep.subr.bf16.mxu0 %v229_v1 }
   0x7   :  { %223 = vmatpush3.bf16.msra.mxu0 %v229_v1 }
   0xa   :  { %225 = vmatmul.mubr.msk.bf16.vlgmr.msra.gmra.mrb[0].mxu0 %vm62_vm0, %v231_v3 }
  0xdd   :  { %v226_v4 = vpop.f32.mrb[0].mxu0 }
  0xde   :  { %v103_v5 = vpop.f32.mrb[1].mxu0  ;;  %v165_v13 = vmul.f32 %v226_v4, %v226_v4 }
  0xdf   :  { %v227_v6 = vpop.f32.mrb[2].mxu0  ;;  %v163_v9 = vmul.f32 %v103_v5, %v103_v5 }
  0xe0   :  { %v213_v7 = vpack.c.bf16 %v227_v6, %v226_v4  ;;  %v106_v8 = vpop.f32.mrb[3].mxu0  ;;  %v166_v16 = vmul.f32 %v227_v6, %v227_v6 }
  0xe1   :  { %v208_v10 = vpack.c.bf16 %v106_v8, %v103_v5  ;;  %v153_v11 = vadd.f32 %v106_v8, %v103_v5  ;;  %v164_v12 = vmul.f32 %v106_v8, %v106_v8 }
  0xe2   :  { %215 = vst [vmem:[%s283_s2 + $0x8] sm:$0xff] %v213_v7  }
  0xe3   :  { %209 = vst [vmem:[%s283_s2] sm:$0xff] %v208_v10   ;;  %v154_v14 = vadd.f32 %v226_v4, %v153_v11  ;;  %v167_v15 = vadd.f32 %v164_v12, %v163_v9 }
  0xe5   :  { %v155_v17 = vadd.f32 %v227_v6, %v154_v14  ;;  %v168_v18 = vadd.f32 %v167_v15, %v165_v13 }
  0xe7   :  { %v156_v19 = vrot.slane %v155_v17, 4  ;;  %v169_v20 = vadd.f32 %v168_v18, %v166_v16 }
  0xe9   :  { %v157_v21 = vadd.f32 %v156_v19, %v155_v17  ;;  %v170_v22 = vrot.slane %v169_v20, 4 }
  0xeb   :  { %v158_v23 = vrot.slane %v157_v21, 2  ;;  %v171_v24 = vadd.f32 %v170_v22, %v169_v20 }
  0xed   :  { %v159_v25 = vadd.f32 %v158_v23, %v157_v21  ;;  %v172_v26 = vrot.slane %v171_v24, 2 }
  0xef   :  { %v160_v27 = vrot.slane %v159_v25, 1  ;;  %v173_v28 = vadd.f32 %v172_v26, %v171_v24 }
  0xf1   :  { %v161_v29 = vadd.f32 %v160_v27, %v159_v25  ;;  %v174_v30 = vrot.slane %v173_v28, 1 }
  0xf3   :  { %162 = vst [vmem:[%s284_s3] sm:$0x1] %v161_v29  ;;  %v175_v31 = vadd.f32 %v174_v30, %v173_v28 }
  0xf5   :  { %176 = vst [vmem:[%s285_s4] sm:$0x1] %v175_v31 }

</bundles_post_ra>
